<compile_context>
chip_gen: v5e
topology: v5e:2x2
jax: 0.10.0
libtpu: 0.0.40
codegen_flags: <defaults>
</compile_context>

<pallas_src>
import math

import jax
import jax.numpy as jnp
from jax import lax
from jax.experimental import pallas as pl
from jax.experimental.pallas import tpu as pltpu

NUM_MODELS = 8          # M
FEATURE_DIM = 32        # attention embed dim
NUM_HEADS = 4
HEAD_DIM = FEATURE_DIM // NUM_HEADS
HIDDEN = 16
IN_FEATS = 3
IN_PAD = 8              # x padded to 8 lanes
BATCH = 2

# ---- packed-parameter layout: one (PACK_ROWS, 128) f32 buffer ---------------
PACK_ROWS = 80
PACK_LANES = 128
OFF_WVO = 0               # (32, 128) rows 0:32,  lanes 0:128   (Wv_t @ Wo_t per head)
OFF_WQK = 32              # (32, 64)  rows 32:64, lanes 0:64    (scale folded into Q)
OFF_W3, COL_W3 = 32, 64   # (32, 16)  rows 32:64, lanes 64:80
OFF_W2, COL_AUX = 32, 80  # (16, 32)  rows 32:48, lanes 80:112
OFF_W1 = 48               # (8, 16)   rows 48:56, lanes 80:96   (rows 3:8 zero)
OFF_B1 = 56               # (1, 16)   lanes 80:96
OFF_B2 = 57               # (1, 32)   lanes 80:112
OFF_B3 = 58               # (1, 16)   lanes 80:96  (b3 + folded attn bias)
OFF_W4 = 59               # (1, 16)   lanes 80:96
OFF_B4 = 60               # (1, 1)    lane  80
OFF_BQK = 64              # (1, 64)   lanes 0:64
OFF_MASK, COL_MASK = 64, 64  # (16, 16) rows 64:80, lanes 64:80 (block-diag mask)

_NT = (((1,), (1,)), ((), ()))  # contract dim-1 of both operands  (A @ B.T)


def _make_kernel(batch, num_models):
    B, M = batch, num_models
    F, H, D, HID = FEATURE_DIM, NUM_HEADS, HEAD_DIM, HIDDEN
    R = B * M

    def kernel(x_ref, p_ref, out_ref):
        # Static slices into the single packed weight buffer (all (in, out)).
        w1 = p_ref[OFF_W1:OFF_W1 + IN_PAD, COL_AUX:COL_AUX + HID]      # (8, 16)
        b1 = p_ref[OFF_B1:OFF_B1 + 1, COL_AUX:COL_AUX + HID]
        w2 = p_ref[OFF_W2:OFF_W2 + HID, COL_AUX:COL_AUX + F]           # (16, 32)
        b2 = p_ref[OFF_B2:OFF_B2 + 1, COL_AUX:COL_AUX + F]
        wqk = p_ref[OFF_WQK:OFF_WQK + F, 0:2 * F]                      # (32, 64)
        bqk = p_ref[OFF_BQK:OFF_BQK + 1, 0:2 * F]
        wvo = p_ref[OFF_WVO:OFF_WVO + F, 0:H * F]                      # (32, 128)
        w3 = p_ref[OFF_W3:OFF_W3 + F, COL_W3:COL_W3 + HID]             # (32, 16)
        b3 = p_ref[OFF_B3:OFF_B3 + 1, COL_AUX:COL_AUX + HID]           # attn bias folded in
        w4 = p_ref[OFF_W4:OFF_W4 + 1, COL_AUX:COL_AUX + HID]           # (1, 16)
        b4 = p_ref[OFF_B4:OFF_B4 + 1, COL_AUX:COL_AUX + 1]             # (1, 1)
        mask = p_ref[OFF_MASK:OFF_MASK + R, COL_MASK:COL_MASK + R]     # (16, 16)

        x = x_ref[...]                                                 # (B*M, 8)

        # feature_net: Linear(3,16) -> ReLU -> Linear(16,32), one slab.
        h1 = jnp.maximum(jnp.dot(x, w1, preferred_element_type=jnp.float32) + b1, 0.0)
        feat = jnp.dot(h1, w2, preferred_element_type=jnp.float32) + b2            # (16, 32)

        # Fused Q/K projection (1/sqrt(head_dim) folded into Q) and fused
        # V*Wo projection (out-proj folded in; its bias folded into b3).
        qk = jnp.dot(feat, wqk, preferred_element_type=jnp.float32) + bqk          # (16, 64)
        vo = jnp.dot(feat, wvo, preferred_element_type=jnp.float32)                # (16, 128)
        q = qk[:, 0:F]
        k = qk[:, F:2 * F]

        # Block-diagonal 4-head attention over both batches at once.
        ps = []
        for h in range(H):
            lo = h * D
            s = lax.dot_general(q[:, lo:lo + D], k[:, lo:lo + D], _NT,
                                preferred_element_type=jnp.float32) + mask         # (16, 16)
            s = s - jnp.max(s, axis=-1, keepdims=True)
            e = jnp.exp(s)
            ps.append(e * pl.reciprocal(jnp.sum(e, axis=-1, keepdims=True), approx=True))

        # Back-to-back accumulation (MRB-friendly on v7x).
        acc = jnp.dot(ps[0], vo[:, 0:F], preferred_element_type=jnp.float32)       # (16, 32)
        for h in range(1, H):
            acc = acc + jnp.dot(ps[h], vo[:, h * F:(h + 1) * F],
                                preferred_element_type=jnp.float32)

        # weight_net: Linear(32,16) -> ReLU -> Linear(16,1) -> Softplus,
        # run once on the full (16, 32) slab; logits land lane-dense (1, 16).
        h2 = jnp.maximum(jnp.dot(acc, w3, preferred_element_type=jnp.float32) + b3, 0.0)
        logit = lax.dot_general(w4, h2, _NT, preferred_element_type=jnp.float32) + b4   # (1, 16)
        sp = jnp.where(logit > 20.0, logit,
                       jnp.log1p(jnp.exp(jnp.minimum(logit, 20.0))))

        # Final per-batch softmax over the model axis — exact divide.
        for b in range(B):
            row = sp[:, b * M:(b + 1) * M]                                          # (1, 8)
            row = row - jnp.max(row, axis=-1, keepdims=True)
            e = jnp.exp(row)
            out_ref[b:b + 1, :] = e / jnp.sum(e, axis=-1, keepdims=True)

    return kernel


def pack_params(p):
    """One-time (init) packing: pre-transpose, fuse QK / fold Wo into Wv,
    fold all attention biases into the weight_net bias, pack into (80,128)."""
    f32 = lambda a: jnp.asarray(a, jnp.float32)
    scale = 1.0 / math.sqrt(HEAD_DIM)
    D, H = HEAD_DIM, NUM_HEADS

    wq_t, wk_t = f32(p["wq"]).T * scale, f32(p["wk"]).T
    wv_t, wo_t = f32(p["wv"]).T, f32(p["wo"]).T
    wqk = jnp.concatenate([wq_t, wk_t], axis=1)                          # (32, 64)
    bqk = jnp.concatenate([f32(p["bq"]) * scale, f32(p["bk"])], axis=1)  # (1, 64)

    # Fold out-proj into V, per head: Wvo_h = Wv_t[:, h] @ Wo_t[h, :].
    wvo = jnp.concatenate(
        [wv_t[:, h * D:(h + 1) * D] @ wo_t[h * D:(h + 1) * D, :] for h in range(H)],
        axis=1)                                                          # (32, 128)

    # Softmax rows sum to 1 => V/out-proj biases collapse to a constant,
    # which folds further into weight_net's first bias (ReLU comes after).
    w3_t = f32(p["w3"]).T                                                # (32, 16)
    b_attn = f32(p["bv"]) @ wo_t + f32(p["bo"])                          # (1, 32)
    b3p = f32(p["b3"]) + b_attn @ w3_t                                   # (1, 16)

    # Block-diagonal attention mask (large finite negative, not -inf).
    R, M = BATCH * NUM_MODELS, NUM_MODELS
    rid = (jnp.arange(R)[:, None] // M)
    cid = (jnp.arange(R)[None, :] // M)
    mask = jnp.where(rid == cid, 0.0, -1e30).astype(jnp.float32)         # (16, 16)

    buf = jnp.zeros((PACK_ROWS, PACK_LANES), jnp.float32)

    def put(b, r, c, arr):
        arr = jnp.asarray(arr, jnp.float32)
        return b.at[r:r + arr.shape[0], c:c + arr.shape[1]].set(arr)

    buf = put(buf, OFF_WVO, 0, wvo)
    buf = put(buf, OFF_WQK, 0, wqk)
    buf = put(buf, OFF_BQK, 0, bqk)
    buf = put(buf, OFF_W3, COL_W3, w3_t)
    buf = put(buf, OFF_W2, COL_AUX, f32(p["w2"]).T)
    buf = put(buf, OFF_W1, COL_AUX, f32(p["w1"]).T)   # (3,16); rows 3:8 stay zero
    buf = put(buf, OFF_B1, COL_AUX, f32(p["b1"]))
    buf = put(buf, OFF_B2, COL_AUX, f32(p["b2"]))
    buf = put(buf, OFF_B3, COL_AUX, b3p)
    buf = put(buf, OFF_W4, COL_AUX, f32(p["w4"]))     # (1, 16), row layout
    buf = put(buf, OFF_B4, COL_AUX, f32(p["b4"]))     # (1, 1)
    buf = put(buf, OFF_MASK, COL_MASK, mask)
    return buf


@jax.jit
def meta_weighting_forward(x, packed):
    """x: (B, M, 3) float32, packed: pack_params(params) -> weights (B, M)."""
    B, M, _ = x.shape
    x_flat = x.reshape(B * M, IN_FEATS)
    # Pad to 8 lanes: one small contiguous input DMA, no in-kernel slicing
    # (W1 is packed with zero rows 3:8, so the padding contributes nothing).
    x_pad = jnp.zeros((B * M, IN_PAD), jnp.float32).at[:, :IN_FEATS].set(x_flat)

    return pl.pallas_call(
        _make_kernel(B, M),
        out_shape=jax.ShapeDtypeStruct((B, M), jnp.float32),
        grid=(1,),   # single step: whole problem fits in one latency-bound shot
        in_specs=[pl.BlockSpec((B * M, IN_PAD), lambda i: (0, 0)),
                  pl.BlockSpec((PACK_ROWS, PACK_LANES), lambda i: (0, 0))],
        out_specs=pl.BlockSpec((B, M), lambda i: (0, 0)),
        compiler_params=pltpu.CompilerParams(
            dimension_semantics=("arbitrary",)),
    )(x_pad, packed)


def init_params(key):
    """Deterministic synthetic parameters (PyTorch-style uniform fan-in init)."""
    def linear(key, out_f, in_f):
        k1, k2 = jax.random.split(key)
        bound = 1.0 / math.sqrt(in_f)
        w = jax.random.uniform(k1, (out_f, in_f), jnp.float32, -bound, bound)
        b = jax.random.uniform(k2, (1, out_f), jnp.float32, -bound, bound)
        return w, b

    keys = jax.random.split(key, 8)
    w1, b1 = linear(keys[0], HIDDEN, IN_FEATS)           # feature_net.0
    w2, b2 = linear(keys[1], FEATURE_DIM, HIDDEN)        # feature_net.2
    wq, bq = linear(keys[2], FEATURE_DIM, FEATURE_DIM)   # in_proj (q chunk)
    wk, bk = linear(keys[3], FEATURE_DIM, FEATURE_DIM)   # in_proj (k chunk)
    wv, bv = linear(keys[4], FEATURE_DIM, FEATURE_DIM)   # in_proj (v chunk)
    wo, bo = linear(keys[5], FEATURE_DIM, FEATURE_DIM)   # out_proj
    w3, b3 = linear(keys[6], HIDDEN, FEATURE_DIM)        # weight_net.0
    w4, b4 = linear(keys[7], 1, HIDDEN)                  # weight_net.2
    return dict(w1=w1, b1=b1, w2=w2, b2=b2,
                wq=wq, bq=bq, wk=wk, bk=bk, wv=wv, bv=bv, wo=wo, bo=bo,
                w3=w3, b3=b3, w4=w4, b4=b4)


def reference_forward(x, p):
    """Pure-JAX reference mirroring the PyTorch module."""
    h1 = jnp.maximum(x @ p["w1"].T + p["b1"], 0.0)
    feat = h1 @ p["w2"].T + p["b2"]                      # (B, M, F)

    q = feat @ p["wq"].T + p["bq"]
    k = feat @ p["wk"].T + p["bk"]
    v = feat @ p["wv"].T + p["bv"]
    B, M, F = q.shape
    qh = q.reshape(B, M, NUM_HEADS, HEAD_DIM).transpose(0, 2, 1, 3)
    kh = k.reshape(B, M, NUM_HEADS, HEAD_DIM).transpose(0, 2, 1, 3)
    vh = v.reshape(B, M, NUM_HEADS, HEAD_DIM).transpose(0, 2, 1, 3)
    s = jnp.einsum("bhqd,bhkd->bhqk", qh, kh) / math.sqrt(HEAD_DIM)
    p_attn = jax.nn.softmax(s, axis=-1)
    o = jnp.einsum("bhqk,bhkd->bhqd", p_attn, vh)
    o = o.transpose(0, 2, 1, 3).reshape(B, M, F)
    attn = o @ p["wo"].T + p["bo"]

    h2 = jnp.maximum(attn @ p["w3"].T + p["b3"], 0.0)
    logits = (h2 @ p["w4"].T + p["b4"])[..., 0]
    sp = jnp.where(logits > 20.0, logits,
                   jnp.log1p(jnp.exp(jnp.minimum(logits, 20.0))))
    return jax.nn.softmax(sp, axis=-1)


if __name__ == "__main__":
    key = jax.random.PRNGKey(0)
    pkey, xkey = jax.random.split(key)
    params = init_params(pkey)
    x = jax.random.normal(xkey, (BATCH, NUM_MODELS, IN_FEATS), jnp.float32)

    packed = pack_params(params)          # once at init — off the per-call path
    out = meta_weighting_forward(x, packed)
    jax.block_until_ready(out)

    ref = reference_forward(x, params)
    assert out.shape == (BATCH, NUM_MODELS)
    # approx=True reciprocal in the attention softmax -> slightly looser rtol.
    assert jnp.allclose(out, ref, rtol=2e-2, atol=2e-3), (out, ref)
    # Final softmax uses an exact divide -> rows sum to 1 to f32 precision.
    assert jnp.allclose(jnp.sum(out, axis=-1), 1.0, atol=1e-5)

    print("KERNEL_OK")
</pallas_src>

<mosaic_0001>
module attributes {stable_mosaic.version = 11 : i64} {
  func.func @kernel(%arg0: i32, %arg1: memref<16x8xf32, #tpu.memory_space<vmem>>, %arg2: memref<80x128xf32, #tpu.memory_space<vmem>>, %arg3: memref<2x8xf32, #tpu.memory_space<vmem>>) attributes {dimension_semantics = [#tpu.dimension_semantics<arbitrary>], iteration_bounds = array<i64: 1>, scalar_prefetch = 0 : i64, scratch_operands = 0 : i64, tpu.core_type = #tpu.core_type<tc>, window_params = [{pipeline_mode = #tpu.pipeline_mode<synchronous>, transform_indices = @transform_0, window_bounds = array<i64: 16, 8>}, {pipeline_mode = #tpu.pipeline_mode<synchronous>, transform_indices = @transform_1, window_bounds = array<i64: 80, 128>}, {pipeline_mode = #tpu.pipeline_mode<synchronous>, transform_indices = @transform_2, window_bounds = array<i64: 2, 8>}]} {
    %c48 = arith.constant 48 : index
    %c80 = arith.constant 80 : index
    %0 = vector.load %arg2[%c48, %c80] : memref<80x128xf32, #tpu.memory_space<vmem>>, vector<8x16xf32>
    %c56 = arith.constant 56 : index
    %c80_0 = arith.constant 80 : index
    %1 = vector.load %arg2[%c56, %c80_0] : memref<80x128xf32, #tpu.memory_space<vmem>>, vector<1x16xf32>
    %c32 = arith.constant 32 : index
    %c80_1 = arith.constant 80 : index
    %2 = vector.load %arg2[%c32, %c80_1] : memref<80x128xf32, #tpu.memory_space<vmem>>, vector<16x32xf32>
    %c57 = arith.constant 57 : index
    %c80_2 = arith.constant 80 : index
    %3 = vector.load %arg2[%c57, %c80_2] : memref<80x128xf32, #tpu.memory_space<vmem>>, vector<1x32xf32>
    %c32_3 = arith.constant 32 : index
    %c0 = arith.constant 0 : index
    %4 = vector.load %arg2[%c32_3, %c0] : memref<80x128xf32, #tpu.memory_space<vmem>>, vector<32x64xf32>
    %c64 = arith.constant 64 : index
    %c0_4 = arith.constant 0 : index
    %5 = vector.load %arg2[%c64, %c0_4] : memref<80x128xf32, #tpu.memory_space<vmem>>, vector<1x64xf32>
    %c0_5 = arith.constant 0 : index
    %c0_6 = arith.constant 0 : index
    %6 = vector.load %arg2[%c0_5, %c0_6] : memref<80x128xf32, #tpu.memory_space<vmem>>, vector<32x128xf32>
    %c32_7 = arith.constant 32 : index
    %c64_8 = arith.constant 64 : index
    %7 = vector.load %arg2[%c32_7, %c64_8] : memref<80x128xf32, #tpu.memory_space<vmem>>, vector<32x16xf32>
    %c58 = arith.constant 58 : index
    %c80_9 = arith.constant 80 : index
    %8 = vector.load %arg2[%c58, %c80_9] : memref<80x128xf32, #tpu.memory_space<vmem>>, vector<1x16xf32>
    %c59 = arith.constant 59 : index
    %c80_10 = arith.constant 80 : index
    %9 = vector.load %arg2[%c59, %c80_10] : memref<80x128xf32, #tpu.memory_space<vmem>>, vector<1x16xf32>
    %c60 = arith.constant 60 : index
    %c80_11 = arith.constant 80 : index
    %10 = vector.load %arg2[%c60, %c80_11] : memref<80x128xf32, #tpu.memory_space<vmem>>, vector<1x1xf32>
    %c64_12 = arith.constant 64 : index
    %c64_13 = arith.constant 64 : index
    %11 = vector.load %arg2[%c64_12, %c64_13] : memref<80x128xf32, #tpu.memory_space<vmem>>, vector<16x16xf32>
    %c0_14 = arith.constant 0 : index
    %c0_15 = arith.constant 0 : index
    %12 = vector.load %arg1[%c0_14, %c0_15] : memref<16x8xf32, #tpu.memory_space<vmem>>, vector<16x8xf32>
    %cst = arith.constant dense<0.000000e+00> : vector<16x16xf32>
    %13 = tpu.matmul %12, %0, %cst {dimension_numbers = #tpu.dot_dimension_numbers<[1], [0], [0], [1], [0, 0, 1, 1], [], []>} : vector<16x8xf32>, vector<8x16xf32>, vector<16x16xf32> -> vector<16x16xf32>
    %14 = vector.broadcast %1 : vector<1x16xf32> to vector<16x16xf32>
    %15 = arith.addf %13, %14 : vector<16x16xf32>
    %cst_16 = arith.constant 0.000000e+00 : f32
    %16 = vector.broadcast %cst_16 : f32 to vector<16x16xf32>
    %17 = arith.maximumf %15, %16 : vector<16x16xf32>
    %cst_17 = arith.constant dense<0.000000e+00> : vector<16x32xf32>
    %18 = tpu.matmul %17, %2, %cst_17 {dimension_numbers = #tpu.dot_dimension_numbers<[1], [0], [0], [1], [0, 0, 1, 1], [], []>} : vector<16x16xf32>, vector<16x32xf32>, vector<16x32xf32> -> vector<16x32xf32>
    %19 = vector.broadcast %3 : vector<1x32xf32> to vector<16x32xf32>
    %20 = arith.addf %18, %19 : vector<16x32xf32>
    %cst_18 = arith.constant dense<0.000000e+00> : vector<16x64xf32>
    %21 = tpu.matmul %20, %4, %cst_18 {dimension_numbers = #tpu.dot_dimension_numbers<[1], [0], [0], [1], [0, 0, 1, 1], [], []>} : vector<16x32xf32>, vector<32x64xf32>, vector<16x64xf32> -> vector<16x64xf32>
    %22 = vector.broadcast %5 : vector<1x64xf32> to vector<16x64xf32>
    %23 = arith.addf %21, %22 : vector<16x64xf32>
    %cst_19 = arith.constant dense<0.000000e+00> : vector<16x128xf32>
    %24 = tpu.matmul %20, %6, %cst_19 {dimension_numbers = #tpu.dot_dimension_numbers<[1], [0], [0], [1], [0, 0, 1, 1], [], []>} : vector<16x32xf32>, vector<32x128xf32>, vector<16x128xf32> -> vector<16x128xf32>
    %25 = vector.extract_strided_slice %23 {offsets = [0, 0], sizes = [16, 32], strides = [1, 1]} : vector<16x64xf32> to vector<16x32xf32>
    %26 = vector.extract_strided_slice %23 {offsets = [0, 32], sizes = [16, 32], strides = [1, 1]} : vector<16x64xf32> to vector<16x32xf32>
    %27 = vector.extract_strided_slice %25 {offsets = [0, 0], sizes = [16, 8], strides = [1, 1]} : vector<16x32xf32> to vector<16x8xf32>
    %28 = vector.extract_strided_slice %26 {offsets = [0, 0], sizes = [16, 8], strides = [1, 1]} : vector<16x32xf32> to vector<16x8xf32>
    %cst_20 = arith.constant dense<0.000000e+00> : vector<16x16xf32>
    %29 = tpu.matmul %27, %28, %cst_20 {dimension_numbers = #tpu.dot_dimension_numbers<[1], [1], [0], [0], [0, 0, 1, 0], [], []>} : vector<16x8xf32>, vector<16x8xf32>, vector<16x16xf32> -> vector<16x16xf32>
    %30 = arith.addf %29, %11 : vector<16x16xf32>
    %cst_21 = arith.constant dense<0xFF800000> : vector<16xf32>
    %31 = vector.multi_reduction <maximumf>, %30, %cst_21 [1] : vector<16x16xf32> to vector<16xf32>
    %32 = vector.shape_cast %31 : vector<16xf32> to vector<16x1xf32>
    %33 = vector.broadcast %32 : vector<16x1xf32> to vector<16x16xf32>
    %34 = arith.subf %30, %33 : vector<16x16xf32>
    %35 = math.exp %34 : vector<16x16xf32>
    %cst_22 = arith.constant dense<0.000000e+00> : vector<16xf32>
    %36 = vector.multi_reduction <add>, %35, %cst_22 [1] : vector<16x16xf32> to vector<16xf32>
    %37 = vector.shape_cast %36 : vector<16xf32> to vector<16x1xf32>
    %38 = tpu.reciprocal %37 {approx = true} : vector<16x1xf32> -> vector<16x1xf32>
    %39 = vector.broadcast %38 : vector<16x1xf32> to vector<16x16xf32>
    %40 = arith.mulf %35, %39 : vector<16x16xf32>
    %41 = vector.extract_strided_slice %25 {offsets = [0, 8], sizes = [16, 8], strides = [1, 1]} : vector<16x32xf32> to vector<16x8xf32>
    %42 = vector.extract_strided_slice %26 {offsets = [0, 8], sizes = [16, 8], strides = [1, 1]} : vector<16x32xf32> to vector<16x8xf32>
    %cst_23 = arith.constant dense<0.000000e+00> : vector<16x16xf32>
    %43 = tpu.matmul %41, %42, %cst_23 {dimension_numbers = #tpu.dot_dimension_numbers<[1], [1], [0], [0], [0, 0, 1, 0], [], []>} : vector<16x8xf32>, vector<16x8xf32>, vector<16x16xf32> -> vector<16x16xf32>
    %44 = arith.addf %43, %11 : vector<16x16xf32>
    %cst_24 = arith.constant dense<0xFF800000> : vector<16xf32>
    %45 = vector.multi_reduction <maximumf>, %44, %cst_24 [1] : vector<16x16xf32> to vector<16xf32>
    %46 = vector.shape_cast %45 : vector<16xf32> to vector<16x1xf32>
    %47 = vector.broadcast %46 : vector<16x1xf32> to vector<16x16xf32>
    %48 = arith.subf %44, %47 : vector<16x16xf32>
    %49 = math.exp %48 : vector<16x16xf32>
    %cst_25 = arith.constant dense<0.000000e+00> : vector<16xf32>
    %50 = vector.multi_reduction <add>, %49, %cst_25 [1] : vector<16x16xf32> to vector<16xf32>
    %51 = vector.shape_cast %50 : vector<16xf32> to vector<16x1xf32>
    %52 = tpu.reciprocal %51 {approx = true} : vector<16x1xf32> -> vector<16x1xf32>
    %53 = vector.broadcast %52 : vector<16x1xf32> to vector<16x16xf32>
    %54 = arith.mulf %49, %53 : vector<16x16xf32>
    %55 = vector.extract_strided_slice %25 {offsets = [0, 16], sizes = [16, 8], strides = [1, 1]} : vector<16x32xf32> to vector<16x8xf32>
    %56 = vector.extract_strided_slice %26 {offsets = [0, 16], sizes = [16, 8], strides = [1, 1]} : vector<16x32xf32> to vector<16x8xf32>
    %cst_26 = arith.constant dense<0.000000e+00> : vector<16x16xf32>
    %57 = tpu.matmul %55, %56, %cst_26 {dimension_numbers = #tpu.dot_dimension_numbers<[1], [1], [0], [0], [0, 0, 1, 0], [], []>} : vector<16x8xf32>, vector<16x8xf32>, vector<16x16xf32> -> vector<16x16xf32>
    %58 = arith.addf %57, %11 : vector<16x16xf32>
    %cst_27 = arith.constant dense<0xFF800000> : vector<16xf32>
    %59 = vector.multi_reduction <maximumf>, %58, %cst_27 [1] : vector<16x16xf32> to vector<16xf32>
    %60 = vector.shape_cast %59 : vector<16xf32> to vector<16x1xf32>
    %61 = vector.broadcast %60 : vector<16x1xf32> to vector<16x16xf32>
    %62 = arith.subf %58, %61 : vector<16x16xf32>
    %63 = math.exp %62 : vector<16x16xf32>
    %cst_28 = arith.constant dense<0.000000e+00> : vector<16xf32>
    %64 = vector.multi_reduction <add>, %63, %cst_28 [1] : vector<16x16xf32> to vector<16xf32>
    %65 = vector.shape_cast %64 : vector<16xf32> to vector<16x1xf32>
    %66 = tpu.reciprocal %65 {approx = true} : vector<16x1xf32> -> vector<16x1xf32>
    %67 = vector.broadcast %66 : vector<16x1xf32> to vector<16x16xf32>
    %68 = arith.mulf %63, %67 : vector<16x16xf32>
    %69 = vector.extract_strided_slice %25 {offsets = [0, 24], sizes = [16, 8], strides = [1, 1]} : vector<16x32xf32> to vector<16x8xf32>
    %70 = vector.extract_strided_slice %26 {offsets = [0, 24], sizes = [16, 8], strides = [1, 1]} : vector<16x32xf32> to vector<16x8xf32>
    %cst_29 = arith.constant dense<0.000000e+00> : vector<16x16xf32>
    %71 = tpu.matmul %69, %70, %cst_29 {dimension_numbers = #tpu.dot_dimension_numbers<[1], [1], [0], [0], [0, 0, 1, 0], [], []>} : vector<16x8xf32>, vector<16x8xf32>, vector<16x16xf32> -> vector<16x16xf32>
    %72 = arith.addf %71, %11 : vector<16x16xf32>
    %cst_30 = arith.constant dense<0xFF800000> : vector<16xf32>
    %73 = vector.multi_reduction <maximumf>, %72, %cst_30 [1] : vector<16x16xf32> to vector<16xf32>
    %74 = vector.shape_cast %73 : vector<16xf32> to vector<16x1xf32>
    %75 = vector.broadcast %74 : vector<16x1xf32> to vector<16x16xf32>
    %76 = arith.subf %72, %75 : vector<16x16xf32>
    %77 = math.exp %76 : vector<16x16xf32>
    %cst_31 = arith.constant dense<0.000000e+00> : vector<16xf32>
    %78 = vector.multi_reduction <add>, %77, %cst_31 [1] : vector<16x16xf32> to vector<16xf32>
    %79 = vector.shape_cast %78 : vector<16xf32> to vector<16x1xf32>
    %80 = tpu.reciprocal %79 {approx = true} : vector<16x1xf32> -> vector<16x1xf32>
    %81 = vector.broadcast %80 : vector<16x1xf32> to vector<16x16xf32>
    %82 = arith.mulf %77, %81 : vector<16x16xf32>
    %83 = vector.extract_strided_slice %24 {offsets = [0, 0], sizes = [16, 32], strides = [1, 1]} : vector<16x128xf32> to vector<16x32xf32>
    %cst_32 = arith.constant dense<0.000000e+00> : vector<16x32xf32>
    %84 = tpu.matmul %40, %83, %cst_32 {dimension_numbers = #tpu.dot_dimension_numbers<[1], [0], [0], [1], [0, 0, 1, 1], [], []>} : vector<16x16xf32>, vector<16x32xf32>, vector<16x32xf32> -> vector<16x32xf32>
    %85 = vector.extract_strided_slice %24 {offsets = [0, 32], sizes = [16, 32], strides = [1, 1]} : vector<16x128xf32> to vector<16x32xf32>
    %cst_33 = arith.constant dense<0.000000e+00> : vector<16x32xf32>
    %86 = tpu.matmul %54, %85, %cst_33 {dimension_numbers = #tpu.dot_dimension_numbers<[1], [0], [0], [1], [0, 0, 1, 1], [], []>} : vector<16x16xf32>, vector<16x32xf32>, vector<16x32xf32> -> vector<16x32xf32>
    %87 = arith.addf %84, %86 : vector<16x32xf32>
    %88 = vector.extract_strided_slice %24 {offsets = [0, 64], sizes = [16, 32], strides = [1, 1]} : vector<16x128xf32> to vector<16x32xf32>
    %cst_34 = arith.constant dense<0.000000e+00> : vector<16x32xf32>
    %89 = tpu.matmul %68, %88, %cst_34 {dimension_numbers = #tpu.dot_dimension_numbers<[1], [0], [0], [1], [0, 0, 1, 1], [], []>} : vector<16x16xf32>, vector<16x32xf32>, vector<16x32xf32> -> vector<16x32xf32>
    %90 = arith.addf %87, %89 : vector<16x32xf32>
    %91 = vector.extract_strided_slice %24 {offsets = [0, 96], sizes = [16, 32], strides = [1, 1]} : vector<16x128xf32> to vector<16x32xf32>
    %cst_35 = arith.constant dense<0.000000e+00> : vector<16x32xf32>
    %92 = tpu.matmul %82, %91, %cst_35 {dimension_numbers = #tpu.dot_dimension_numbers<[1], [0], [0], [1], [0, 0, 1, 1], [], []>} : vector<16x16xf32>, vector<16x32xf32>, vector<16x32xf32> -> vector<16x32xf32>
    %93 = arith.addf %90, %92 : vector<16x32xf32>
    %cst_36 = arith.constant dense<0.000000e+00> : vector<16x16xf32>
    %94 = tpu.matmul %93, %7, %cst_36 {dimension_numbers = #tpu.dot_dimension_numbers<[1], [0], [0], [1], [0, 0, 1, 1], [], []>} : vector<16x32xf32>, vector<32x16xf32>, vector<16x16xf32> -> vector<16x16xf32>
    %95 = vector.broadcast %8 : vector<1x16xf32> to vector<16x16xf32>
    %96 = arith.addf %94, %95 : vector<16x16xf32>
    %cst_37 = arith.constant 0.000000e+00 : f32
    %97 = vector.broadcast %cst_37 : f32 to vector<16x16xf32>
    %98 = arith.maximumf %96, %97 : vector<16x16xf32>
    %cst_38 = arith.constant dense<0.000000e+00> : vector<1x16xf32>
    %99 = tpu.matmul %9, %98, %cst_38 {dimension_numbers = #tpu.dot_dimension_numbers<[1], [1], [0], [0], [0, 0, 1, 0], [], []>} : vector<1x16xf32>, vector<16x16xf32>, vector<1x16xf32> -> vector<1x16xf32>
    %100 = vector.broadcast %10 : vector<1x1xf32> to vector<1x16xf32>
    %101 = arith.addf %99, %100 : vector<1x16xf32>
    %cst_39 = arith.constant 2.000000e+01 : f32
    %102 = vector.broadcast %cst_39 : f32 to vector<1x16xf32>
    %103 = arith.cmpf ogt, %101, %102 : vector<1x16xf32>
    %cst_40 = arith.constant 2.000000e+01 : f32
    %104 = vector.broadcast %cst_40 : f32 to vector<1x16xf32>
    %105 = arith.minimumf %101, %104 : vector<1x16xf32>
    %106 = math.exp %105 : vector<1x16xf32>
    %107 = math.log1p %106 : vector<1x16xf32>
    %108 = arith.select %103, %101, %107 : vector<1x16xi1>, vector<1x16xf32>
    %109 = vector.extract_strided_slice %108 {offsets = [0, 0], sizes = [1, 8], strides = [1, 1]} : vector<1x16xf32> to vector<1x8xf32>
    %cst_41 = arith.constant dense<0xFF800000> : vector<1xf32>
    %110 = vector.multi_reduction <maximumf>, %109, %cst_41 [1] : vector<1x8xf32> to vector<1xf32>
    %111 = vector.shape_cast %110 : vector<1xf32> to vector<1x1xf32>
    %112 = vector.broadcast %111 : vector<1x1xf32> to vector<1x8xf32>
    %113 = arith.subf %109, %112 : vector<1x8xf32>
    %114 = math.exp %113 : vector<1x8xf32>
    %cst_42 = arith.constant dense<0.000000e+00> : vector<1xf32>
    %115 = vector.multi_reduction <add>, %114, %cst_42 [1] : vector<1x8xf32> to vector<1xf32>
    %116 = vector.shape_cast %115 : vector<1xf32> to vector<1x1xf32>
    %117 = vector.broadcast %116 : vector<1x1xf32> to vector<1x8xf32>
    %118 = arith.divf %114, %117 : vector<1x8xf32>
    %c0_43 = arith.constant 0 : index
    %c0_44 = arith.constant 0 : index
    %119 = vector.load %arg3[%c0_43, %c0_44] : memref<2x8xf32, #tpu.memory_space<vmem>>, vector<1x8xf32>
    tpu.vector_store %arg3[%c0_43, %c0_44], %118 {strides = array<i32>} : memref<2x8xf32, #tpu.memory_space<vmem>>, vector<1x8xf32>,
    %120 = vector.extract_strided_slice %108 {offsets = [0, 8], sizes = [1, 8], strides = [1, 1]} : vector<1x16xf32> to vector<1x8xf32>
    %cst_45 = arith.constant dense<0xFF800000> : vector<1xf32>
    %121 = vector.multi_reduction <maximumf>, %120, %cst_45 [1] : vector<1x8xf32> to vector<1xf32>
    %122 = vector.shape_cast %121 : vector<1xf32> to vector<1x1xf32>
    %123 = vector.broadcast %122 : vector<1x1xf32> to vector<1x8xf32>
    %124 = arith.subf %120, %123 : vector<1x8xf32>
    %125 = math.exp %124 : vector<1x8xf32>
    %cst_46 = arith.constant dense<0.000000e+00> : vector<1xf32>
    %126 = vector.multi_reduction <add>, %125, %cst_46 [1] : vector<1x8xf32> to vector<1xf32>
    %127 = vector.shape_cast %126 : vector<1xf32> to vector<1x1xf32>
    %128 = vector.broadcast %127 : vector<1x1xf32> to vector<1x8xf32>
    %129 = arith.divf %125, %128 : vector<1x8xf32>
    %c1 = arith.constant 1 : index
    %c0_47 = arith.constant 0 : index
    %130 = vector.load %arg3[%c1, %c0_47] : memref<2x8xf32, #tpu.memory_space<vmem>>, vector<1x8xf32>
    tpu.vector_store %arg3[%c1, %c0_47], %129 {strides = array<i32>} : memref<2x8xf32, #tpu.memory_space<vmem>>, vector<1x8xf32>,
    return
  }
  func.func @transform_0(%arg0: i32) -> (i32, i32) {
    %c0_i32 = arith.constant 0 : i32
    %c0_i32_0 = arith.constant 0 : i32
    %c0_i32_1 = arith.constant 0 : i32
    return %c0_i32, %c0_i32_0 : i32, i32
  }
  func.func @transform_1(%arg0: i32) -> (i32, i32) {
    %c0_i32 = arith.constant 0 : i32
    %c0_i32_0 = arith.constant 0 : i32
    %c0_i32_1 = arith.constant 0 : i32
    return %c0_i32, %c0_i32_0 : i32, i32
  }
  func.func @transform_2(%arg0: i32) -> (i32, i32) {
    %c0_i32 = arith.constant 0 : i32
    %c0_i32_0 = arith.constant 0 : i32
    %c0_i32_1 = arith.constant 0 : i32
    return %c0_i32, %c0_i32_0 : i32, i32
  }
}

</mosaic_0001>

<bundles_post_ra>
// kernel: meta_weighting_forward.1
= control target key start
LH: loop header
LB: loop body
LE: loop exit
PB: predicated region body
PF: predicated region fallthrough
CT: control target
= control target key end

     0   :  { %7 = vsyncpa [#allocation3], 0  ;;  %s1085_s0 = inlined_call_operand.vmem [shape: f32[16,8], index: 0, kind: input, shape index: {}]   ;;  %s1086_s1 = inlined_call_operand.hbm [shape: f32[80,128], index: 1, kind: input, shape index: {}]   ;;  %s1087_s2 = inlined_call_operand.hbm [shape: f32[2,8], index: 2, kind: output, shape index: {}]  }
   0x1   :  { %8 = vsyncpa [#allocation4], 0  ;;  %s15_s11 = sshll.u32 %s1086_s1, 4  ;;  %s934_s12 = smov [#allocation2]   ;;  %s16_s11 = int_to_ptr.hbm [resolvable:$true] %s15_s11 }
   0x2   :  { %s17_s13 = sshll.u32 %s934_s12, 4  ;;  %s935_s14 = smov 128   ;;  %s18_s13 = int_to_ptr.vmem [resolvable:$true] %s17_s13 }
   0x3   :  { %s936_s15 = smov 8  }
   0x4   :  { %23 = dma.hbm_to_vmem [thread:$0]  %s16_s11, 1280, %s18_s13, [#allocation3], %s935_s14, %s935_s14, %s936_s15  }
   0x5   :  { %930 = dma.done.wait [#allocation3], 1280  }
   0x6   :  { %931 = vsyncadd [#allocation3], 4294966016  ;;  %v967_v0 = vld [vmem:[#allocation2 + $0x30] sm:$0xff]  ;;  %s937_s16 = smov 48   ;;  %v30_v1 = vld [vmem:[#allocation2 + $0x20] sm:$0xff]  ;;  %vm55_vm0 = vcmask 64512  }
   0x7   :  { %48 = vrot.lane.b32.xlu0 %v967_v0, %s937_s16  ;;  %v31_v2 = vld [vmem:[#allocation2 + $0x28] sm:$0xff]  ;;  %v834_v3 = vld [vmem:[#allocation2 + $0x38] ss:$0 sm:$0xff]  ;;  %v44_v5 = vld [vmem:[%s1085_s0] sm:$0xff]  ;;  %vm100_vm1 = vcmask 130048   ;;  %vm131_vm2 = vcmask 261120  }
   0x8   :  { %v971_v4 = vpack.i.bf16 %v30_v1, %v31_v2  ;;  %v45_v6 = vld [vmem:[%s1085_s0 + $0x8] sm:$0xff]  ;;  %v835_v11 = vld [vmem:[#allocation2 + $0x39] ss:$0 sm:$0xff]  ;;  %v37_v14 = vld [vmem:[#allocation2 + $0x10] sm:$0xff]  ;;  %s938_s0 = smov 112   ;;  %s939_s20 = smov 72  }
   0x9   :  { %v984_v12 = vld [vmem:[#allocation2 + $0x38] sm:$0xff]  ;;  %v36_v15 = vld [vmem:[#allocation2 + $0x8] sm:$0xff]  ;;  %v35_v23 = vld [vmem:[#allocation2] sm:$0xff]  ;;  %s940_s21 = smov 80   ;;  %s941_s22 = smov 88   ;;  %vm699_vm4 = vcmask 122944  }
   0xa   :  { %804 = vrot.lane.b32.xlu1 %v971_v4, %s937_s16  ;;  %v38_v13 = vld [vmem:[#allocation2 + $0x18] sm:$0xff]  ;;  %v836_v29 = vld [vmem:[#allocation2 + $0x40] ss:$0 sm:$0xff]  ;;  %s942_s23 = smov 104   ;;  %s943_s24 = smov 96   ;;  %v43_v38 = vld [vmem:[#allocation2 + $0x48] sm:$0xff] }
   0xb   :  { %173 = vmatpush.msra.mxu3 %v38_v13  ;;  %s944_s25 = smov 120   ;;  %v42_v36 = vld [vmem:[#allocation2 + $0x40] sm:$0xff]  ;;  %s945_s26 = smov 64   ;;  %vm673_vm6 = vcmask 57344  }
   0xc   :  { %s946_s27 = smov 32   ;;  %s948_s28 = smov [#allocation5]  }
   0xd   :  { %174 = vmatpush.msra.mxu3 %v37_v14  ;;  %s738_s29 = sshll.u32 %s948_s28, 4  ;;  %s740_s4 = sshll.u32 %s1087_s2, 4  ;;  %s739_s29 = int_to_ptr.vmem [resolvable:$true] %s738_s29  ;;  %s741_s4 = int_to_ptr.hbm [resolvable:$true] %s740_s4 }
   0xf   :  { %52 = vrot.lane.b32.xlu0 %v834_v3, %s937_s16  ;;  %175 = vmatpush.msra.mxu3 %v36_v15 }
  0x11   :  { %176 = vmatpush.msra.mxu3 %v35_v23 }
  0x12   :  { %97 = vrot.lane.b32.xlu1 %v835_v11, %s937_s16 }
  0x79   :  { %v49_v7 = vpop.permute.xlu0 %48 }
  0x7a   :  { %77 = vmatpush.msra.mxu0 %v49_v7  ;;  %787 = vmatpush.msra.mxu2 %v49_v7 }
  0x7b   :  { %750 = vmatmul.msk.f32.vlgmr.msra.gmra.mxu0 %vm55_vm0, %v44_v5  ;;  %751 = vmatmul.msk.f32.vlgmr.msra.gmra.mxu2 %vm55_vm0, %v45_v6 }
  0x7c   :  { %v805_v8 = vpop.permute.xlu1 %804  ;;  %150 = vmatpush.msrb.mxu2 %v984_v12 }
  0x7d   :  { %v806_v9 = vunpack.i.l.bf16 %v805_v8  ;;  %v807_v10 = vunpack.i.h.bf16 %v805_v8 }
  0x7e   :  { %151 = vmatpush.msrb.mxu2 %v967_v0 }
  0x7f   :  { %121 = vmatpush.msra.mxu1 %v806_v9 }
  0x80   :  { %152 = vmatpush.msrb.mxu2 %v31_v2 }
  0x81   :  { %122 = vmatpush.msra.mxu1 %v807_v10  ;;  %v53_v16 = vpop.permute.xlu0 %52 }
  0x82   :  { %153 = vmatpush.msrb.mxu2 %v30_v1 }
  0x84   :  { %v98_v24 = vpop.permute.xlu1 %97 }
  0xf8   :  { %v79_v17 = vpop.f32.mrf.mxu0 }
  0xf9   :  { %v80_v18 = vadd.f32 %v79_v17, %v53_v16 }
  0xfb   :  { %v85_v19 = vmax.f32 %v80_v18, 0.0 }
  0xfd   :  { %752 = vmatmul.msk.f32.vlgmr.msra.gmra.mxu1 %vm100_vm1, %v85_v19 }
  0xfe   :  { %v82_v20 = vpop.f32.mrf.mxu2 }
  0xff   :  { %v83_v21 = vadd.f32 %v82_v20, %v53_v16 }
 0x101   :  { %v86_v22 = vmax.f32 %v83_v21, 0.0 }
 0x105   :  { %753 = vmatmul.msk.f32.gmra.mxu1 %vm100_vm1, %v86_v22 }
 0x17a   :  { %v124_v25 = vpop.f32.mrf.mxu1 }
 0x17b   :  { %v125_v26 = vadd.f32 %v124_v25, %v98_v24 }
 0x17d   :  { %754 = vmatmul.msk.f32.vlgmr.msrb.gmra.mxu2 %vm131_vm2, %v125_v26  ;;  %756 = vmatmul.msk.f32.vlgmr.msra.gmra.mxu3 %vm131_vm2, %v125_v26 }
 0x182   :  { %v127_v27 = vpop.f32.mrf.mxu1 }
 0x183   :  { %v128_v28 = vadd.f32 %v127_v27, %v98_v24 }
 0x185   :  { %755 = vmatmul.msk.f32.gmra.mxu2 %vm131_vm2, %v128_v28  ;;  %757 = vmatmul.msk.f32.gmra.mxu3 %vm131_vm2, %v128_v28 }
 0x200   :  { %v155_v30 = vpop.f32.mrf.mxu2  ;;  %v1003_v39 = vpop.f32.mrf.mxu3 }
 0x201   :  { %v156_v31 = vadd.f32 %v836_v29, %v155_v30 }
 0x203   :  { %312 = vrot.lane.b32.xlu2 %v156_v31, %s938_s0  ;;  %377 = vrot.lane.b32.xlu1 %v156_v31, %s939_s20 }
 0x204   :  { %316 = vrot.lane.b32.xlu0 %v156_v31, %s940_s21 }
 0x208   :  { %v158_v32 = vpop.f32.mrf.mxu2  ;;  %v1009_v44 = vpop.f32.mrf.mxu3 }
 0x209   :  { %v159_v33 = vadd.f32 %v836_v29, %v158_v32 }
 0x20b   :  { %318 = vrot.lane.b32.xlu2 %v159_v33, %s940_s21  ;;  %255 = vrot.lane.b32.xlu1 %v156_v31, %s941_s22 }
 0x20c   :  { %373 = vrot.lane.b32.xlu0 %v156_v31, %s942_s23 }
 0x213   :  { %379 = vrot.lane.b32.xlu2 %v159_v33, %s939_s20  ;;  %188 = vrot.lane.b32.xlu1 %v159_v33, %s943_s24 }
 0x214   :  { %186 = vrot.lane.b32.xlu0 %v156_v31, %s943_s24 }
 0x21b   :  { %257 = vrot.lane.b32.xlu2 %v159_v33, %s941_s22  ;;  %375 = vrot.lane.b32.xlu1 %v159_v33, %s942_s23 }
 0x21c   :  { %251 = vrot.lane.b32.xlu0 %v156_v31, %s944_s25 }
 0x223   :  { %314 = vrot.lane.b32.xlu2 %v159_v33, %s938_s0  ;;  %194 = vrot.lane.b32.xlu1 %v43_v38, %s945_s26 }
 0x224   :  { %192 = vrot.lane.b32.xlu0 %v42_v36, %s945_s26 }
 0x22b   :  { %253 = vrot.lane.b32.xlu2 %v159_v33, %s944_s25 }
 0x25d   :  { %v313_v34 = vpop.permute.xlu2 %312 }
 0x265   :  { %v319_v35 = vpop.permute.xlu2 %318 }
 0x266   :  { %766 = vmatpush.xpose.msk.msra.mxu2 %vm55_vm0, %v319_v35 }
 0x26d   :  { %v380_v37 = vpop.permute.xlu2 %379 }
 0x26e   :  { %770 = vmatpush.xpose.msk.msrb.mxu3 %vm55_vm0, %v380_v37 }
 0x275   :  { %v258_v40 = vpop.permute.xlu2 %257  ;;  %v378_v41 = vpop.permute.xlu1 %377 }
 0x276   :  { %v317_v42 = vpop.permute.xlu0 %316  ;;  %762 = vmatpush.xpose.msk.msrb.mxu1 %vm55_vm0, %v258_v40  ;;  %771 = vmatpush.xpose.msk.msrb.mxu3 %vm55_vm0, %v378_v41 }
 0x277   :  { %767 = vmatpush.xpose.msk.msra.mxu2 %vm55_vm0, %v317_v42  ;;  %v808_v42 = vpack.i.bf16 %v1003_v39, %v1009_v44 }
 0x27a   :  { %768 = vmatmul.msk.f32.vlgmr.msra.gmra.mxu2 %vm55_vm0, %v313_v34 }
 0x27d   :  { %v256_v43 = vpop.permute.xlu1 %255  ;;  %v315_v46 = vpop.permute.xlu2 %314 }
 0x27e   :  { %v374_v45 = vpop.permute.xlu0 %373  ;;  %763 = vmatpush.xpose.msk.msrb.mxu1 %vm55_vm0, %v256_v43 }
 0x27f   :  { %772 = vmatmul.msk.f32.vlgmr.msrb.gmra.mxu3 %vm55_vm0, %v374_v45 }
 0x282   :  { %491 = vmatpush.msra.mxu1 %v1009_v44  ;;  %769 = vmatmul.msk.f32.gmra.mxu2 %vm55_vm0, %v315_v46 }
 0x284   :  { %492 = vmatpush.msra.mxu1 %v1003_v39 }
 0x285   :  { %v189_v47 = vpop.permute.xlu1 %188  ;;  %v254_v51 = vpop.permute.xlu2 %253 }
 0x286   :  { %v187_v48 = vpop.permute.xlu0 %186  ;;  %758 = vmatpush.xpose.msk.msrb.mxu0 %vm55_vm0, %v189_v47 }
 0x28a   :  { %759 = vmatpush.xpose.msk.msrb.mxu0 %vm55_vm0, %v187_v48 }
 0x28d   :  { %v376_v49 = vpop.permute.xlu1 %375  ;;  %760 = vmatmul.msk.f32.vlgmr.msrb.gmra.mxu0 %vm55_vm0, %v156_v31 }
 0x28e   :  { %v252_v50 = vpop.permute.xlu0 %251  ;;  %773 = vmatmul.msk.f32.gmra.mxu3 %vm55_vm0, %v376_v49 }
 0x28f   :  { %764 = vmatmul.msk.f32.vlgmr.msrb.gmra.mxu1 %vm55_vm0, %v252_v50 }
 0x295   :  { %761 = vmatmul.msk.f32.gmra.mxu0 %vm55_vm0, %v159_v33  ;;  %v195_v63 = vpop.permute.xlu1 %194 }
 0x296   :  { %v193_v52 = vpop.permute.xlu0 %192 }
 0x297   :  { %765 = vmatmul.msk.f32.gmra.mxu1 %vm55_vm0, %v254_v51 }
 0x2fd   :  { %v345_v62 = vpop.f32.mrf.mxu2 }
 0x2fe   :  { %v346_v6 = vadd.f32 %v345_v62, %v193_v52 }
 0x300   :  { %v351_v9 = vsel %vm100_vm1, %v346_v6, -inf }
 0x302   :  { %v406_v53 = vpop.f32.mrf.mxu3 }
 0x303   :  { %v407_v54 = vadd.f32 %v406_v53, %v193_v52 }
 0x305   :  { %v412_v55 = vsel %vm100_vm1, %v407_v54, -inf  ;;  %v348_v14 = vpop.f32.mrf.mxu2 }
 0x306   :  { %413 = vmax.xlane.f32.xlu0 %v412_v55  ;;  %v349_v15 = vadd.f32 %v348_v14, %v195_v63 }
 0x308   :  { %v354_v16 = vsel %vm100_vm1, %v349_v15, -inf }
 0x30a   :  { %v223_v56 = vpop.f32.mrf.mxu0 }
 0x30b   :  { %v224_v57 = vadd.f32 %v223_v56, %v193_v52  ;;  %v823_v56 = vpack.i.bf16 %v967_v0, %v984_v12 }
 0x30c   :  { %v284_v58 = vpop.f32.mrf.mxu1 }
 0x30d   :  { %v285_v59 = vadd.f32 %v284_v58, %v193_v52  ;;  %v229_v60 = vsel %vm100_vm1, %v224_v57, -inf }
 0x30e   :  { %230 = vmax.xlane.f32.xlu1 %v229_v60 }
 0x30f   :  { %v290_v61 = vsel %vm100_vm1, %v285_v59, -inf }
 0x310   :  { %291 = vmax.xlane.f32.xlu2 %v290_v61 }
 0x311   :  { %v409_v1 = vpop.f32.mrf.mxu3 }
 0x312   :  { %v410_v2 = vadd.f32 %v409_v1, %v195_v63  ;;  %v226_v3 = vpop.f32.mrf.mxu0 }
 0x313   :  { %v1026_v5 = vadd.f32 %v226_v3, %v195_v63 }
 0x314   :  { %v415_v7 = vsel %vm100_vm1, %v410_v2, -inf  ;;  %v287_v10 = vpop.f32.mrf.mxu1 }
 0x315   :  { %416 = vmax.xlane.f32.xlu0 %v415_v7  ;;  %v232_v8 = vsel %vm100_vm1, %v1026_v5, -inf  ;;  %v288_v11 = vadd.f32 %v287_v10, %v195_v63 }
 0x316   :  { %233 = vmax.xlane.f32.xlu1 %v232_v8 }
 0x317   :  { %v293_v13 = vsel %vm100_vm1, %v288_v11, -inf }
 0x318   :  { %352 = vmax.xlane.f32.xlu2 %v351_v9 }
 0x320   :  { %294 = vmax.xlane.f32.xlu2 %v293_v13 }
 0x328   :  { %355 = vmax.xlane.f32.xlu2 %v354_v16 }
 0x379   :  { %v414_v17 = vpop.xlane.xlu0 %413 }
 0x37a   :  { %v418_v18 = vsub.f32 %v407_v54, %v414_v17 }
 0x37c   :  { %v420_v19 = vmul.f32 1.442695, %v418_v18 }
 0x37e   :  { %838 = vpow2.f32 %v420_v19 }
 0x381   :  { %v231_v20 = vpop.xlane.xlu1 %230 }
 0x382   :  { %v235_v21 = vsub.f32 %v224_v57, %v231_v20 }
 0x383   :  { %v292_v22 = vpop.xlane.xlu2 %291 }
 0x384   :  { %v1034_v23 = vpop.eup %838  ;;  %v237_v24 = vmul.f32 1.442695, %v235_v21  ;;  %v296_v25 = vsub.f32 %v285_v59, %v292_v22 }
 0x385   :  { %v424_v26 = vsel %vm100_vm1, %v1034_v23, 0.0 }
 0x386   :  { %840 = vpow2.f32 %v237_v24  ;;  %v298_v27 = vmul.f32 1.442695, %v296_v25  ;;  %425 = vadd.xlane.f32.xlu1 %v424_v26 }
 0x388   :  { %842 = vpow2.f32 %v298_v27  ;;  %v417_v38 = vpop.xlane.xlu0 %416 }
 0x389   :  { %v419_v43 = vsub.f32 %v410_v2, %v417_v38  ;;  %v234_v51 = vpop.xlane.xlu1 %233 }
 0x38a   :  { %v236_v39 = vsub.f32 %v1026_v5, %v234_v51 }
 0x38b   :  { %v353_v28 = vpop.xlane.xlu2 %352  ;;  %v422_v46 = vmul.f32 1.442695, %v419_v43  ;;  %v40_v43 = vld [vmem:[#allocation2 + $0x3b] sm:$0x1] }
 0x38c   :  { %v841_v29 = vpop.eup %840  ;;  %v357_v30 = vsub.f32 %v346_v6, %v353_v28  ;;  %v239_v44 = vmul.f32 1.442695, %v236_v39  ;;  %v41_v39 = vld [vmem:[#allocation2 + $0x3c] sm:$0x1] }
 0x38d   :  { %v241_v31 = vsel %vm100_vm1, %v841_v29, 0.0 }
 0x38e   :  { %v1039_v32 = vpop.eup %842  ;;  %v359_v33 = vmul.f32 1.442695, %v357_v30  ;;  %242 = vadd.xlane.f32.xlu2 %v241_v31 }
 0x38f   :  { %v302_v34 = vsel %vm100_vm1, %v1039_v32, 0.0 }
 0x390   :  { %844 = vpow2.f32 %v359_v33  ;;  %303 = vadd.xlane.f32.xlu0 %v302_v34 }
 0x393   :  { %v295_v35 = vpop.xlane.xlu2 %294 }
 0x394   :  { %v297_v52 = vsub.f32 %v288_v11, %v295_v35 }
 0x396   :  { %v845_v36 = vpop.eup %844  ;;  %v300_v54 = vmul.f32 1.442695, %v297_v52 }
 0x397   :  { %v363_v37 = vsel %vm100_vm1, %v845_v36, 0.0 }
 0x398   :  { %364 = vadd.xlane.f32.xlu0 %v363_v37 }
 0x39b   :  { %v356_v40 = vpop.xlane.xlu2 %355 }
 0x39c   :  { %v358_v41 = vsub.f32 %v349_v15, %v356_v40 }
 0x39e   :  { %v361_v45 = vmul.f32 1.442695, %v358_v41 }
 0x39f   :  { %809 = vrot.lane.b32.xlu1 %v808_v42, %s945_s26 }
 0x3a0   :  { %846 = vpow2.f32 %v361_v45 }
 0x3a1   :  { %848 = vpow2.f32 %v422_v46 }
 0x3a2   :  { %850 = vpow2.f32 %v239_v44  ;;  %v947_v44 = vmov 80  }
 0x3a3   :  { %852 = vpow2.f32 %v300_v54  ;;  %833 = vset.pattern.permute.xlu0 %v947_v44 }
 0x3a6   :  { %v847_v47 = vpop.eup %846 }
 0x3a7   :  { %v366_v48 = vsel %vm100_vm1, %v847_v47, 0.0  ;;  %v849_v49 = vpop.eup %848 }
 0x3a8   :  { %367 = vadd.xlane.f32.xlu2 %v366_v48  ;;  %v427_v50 = vsel %vm100_vm1, %v849_v49, 0.0  ;;  %v851_v53 = vpop.eup %850 }
 0x3a9   :  { %v244_v55 = vsel %vm100_vm1, %v851_v53, 0.0  ;;  %v853_v57 = vpop.eup %852 }
 0x3aa   :  { %v305_v58 = vsel %vm100_vm1, %v853_v57, 0.0 }
 0x3ac   :  { %814 = vrot.lane.b32.xlu0 %v808_v42, %s946_s27 }
 0x3b0   :  { %428 = vadd.xlane.f32.xlu2 %v427_v50 }
 0x3c8   :  { %819 = vrot.lane.b32.xlu2 %v808_v42, %s943_s24  ;;  %v837_v42 = vld [vmem:[#allocation2 + $0x3a] ss:$0 sm:$0xff] }
 0x3c9   :  { %245 = vadd.xlane.f32.xlu1 %v244_v55 }
 0x3d0   :  { %824 = vrot.lane.b32.xlu2 %v823_v56, %s945_s26 }
 0x3d6   :  { %306 = vadd.xlane.f32.xlu0 %v305_v58 }
 0x3d8   :  { %829 = vrot.lane.b32.xlu2 %v971_v4, %s945_s26 }
 0x3e0   :  { %589 = vrot.lane.b32.xlu2 %v837_v42, %s937_s16 }
 0x3e2   :  { %629 = vrot.lane.b32.xlu1 %v40_v43, %s937_s16 }
 0x3ea   :  { %625 = vperm.xlu0 %833, %v41_v39  }
 0x3f9   :  { %v426_v62 = vpop.xlane.xlu1 %425 }
 0x401   :  { %v243_v59 = vpop.xlane.xlu2 %242 }
 0x402   :  { %854 = vrcp.f32 %v243_v59 }
 0x403   :  { %v304_v60 = vpop.xlane.xlu0 %303 }
 0x408   :  { %v855_v61 = vpop.eup %854 }
 0x409   :  { %v249_v63 = vmul.f32 %v855_v61, %v841_v29 }
 0x40b   :  { %v365_v1 = vpop.xlane.xlu0 %364  ;;  %776 = vmatmul.msk.f32.vlgmr.msra.gmra.mxu1 %vm100_vm1, %v249_v63 }
 0x40c   :  { %856 = vrcp.f32 %v365_v1 }
 0x40d   :  { %858 = vrcp.f32 %v426_v62 }
 0x411   :  { %v810_v2 = vpop.permute.xlu1 %809 }
 0x412   :  { %v857_v3 = vpop.eup %856  ;;  %v811_v0 = vunpack.i.l.bf16 %v810_v2  ;;  %v812_v12 = vunpack.i.h.bf16 %v810_v2 }
 0x413   :  { %v371_v5 = vmul.f32 %v857_v3, %v845_v36  ;;  %v859_v8 = vpop.eup %858 }
 0x414   :  { %526 = vmatpush.msrb.mxu2 %v811_v0  ;;  %v432_v13 = vmul.f32 %v859_v8, %v1034_v23 }
 0x416   :  { %527 = vmatpush.msrb.mxu2 %v812_v12 }
 0x417   :  { %778 = vmatmul.msk.f32.vlgmr.msrb.gmra.mxu2 %vm100_vm1, %v371_v5 }
 0x41b   :  { %v368_v6 = vpop.xlane.xlu2 %367 }
 0x41c   :  { %860 = vrcp.f32 %v368_v6 }
 0x41e   :  { %v815_v7 = vpop.permute.xlu0 %814 }
 0x41f   :  { %v816_v9 = vunpack.i.l.bf16 %v815_v7  ;;  %v817_v10 = vunpack.i.h.bf16 %v815_v7 }
 0x421   :  { %563 = vmatpush.msra.mxu3 %v816_v9 }
 0x422   :  { %v861_v11 = vpop.eup %860 }
 0x423   :  { %564 = vmatpush.msra.mxu3 %v817_v10  ;;  %v429_v14 = vpop.xlane.xlu2 %428  ;;  %v372_v15 = vmul.f32 %v861_v11, %v847_v47 }
 0x424   :  { %862 = vrcp.f32 %v429_v14  ;;  %780 = vmatmul.msk.f32.vlgmr.msra.gmra.mxu3 %vm100_vm1, %v432_v13 }
 0x425   :  { %779 = vmatmul.msk.f32.gmra.mxu2 %vm100_vm1, %v372_v15  ;;  %864 = vrcp.f32 %v304_v60 }
 0x42a   :  { %v863_v16 = vpop.eup %862 }
 0x42b   :  { %v820_v17 = vpop.permute.xlu2 %819  ;;  %v433_v18 = vmul.f32 %v863_v16, %v849_v49  ;;  %v865_v19 = vpop.eup %864 }
 0x42c   :  { %v821_v20 = vunpack.i.l.bf16 %v820_v17  ;;  %v822_v21 = vunpack.i.h.bf16 %v820_v17  ;;  %v310_v22 = vmul.f32 %v865_v19, %v1039_v32 }
 0x42d   :  { %781 = vmatmul.msk.f32.gmra.mxu3 %vm100_vm1, %v433_v18 }
 0x42e   :  { %462 = vmatpush.msra.mxu0 %v821_v20 }
 0x430   :  { %463 = vmatpush.msra.mxu0 %v822_v21 }
 0x431   :  { %774 = vmatmul.msk.f32.vlgmr.msra.gmra.mxu0 %vm100_vm1, %v310_v22 }
 0x433   :  { %v825_v29 = vpop.permute.xlu2 %824 }
 0x434   :  { %v827_v30 = vunpack.i.h.bf16 %v825_v29  ;;  %v826_v31 = vunpack.i.l.bf16 %v825_v29 }
 0x436   :  { %610 = vmatpush.msrb.mxu0 %v826_v31 }
 0x438   :  { %611 = vmatpush.msrb.mxu0 %v827_v30 }
 0x43b   :  { %v830_v32 = vpop.permute.xlu2 %829 }
 0x43c   :  { %v246_v23 = vpop.xlane.xlu1 %245  ;;  %v831_v33 = vunpack.i.l.bf16 %v830_v32  ;;  %v832_v4 = vunpack.i.h.bf16 %v830_v32 }
 0x43d   :  { %866 = vrcp.f32 %v246_v23 }
 0x43e   :  { %612 = vmatpush.msrb.mxu0 %v831_v33 }
 0x440   :  { %613 = vmatpush.msrb.mxu0 %v832_v4 }
 0x443   :  { %v867_v24 = vpop.eup %866 }
 0x444   :  { %v250_v25 = vmul.f32 %v867_v24, %v851_v53  ;;  %v590_v53 = vpop.permute.xlu2 %589 }
 0x446   :  { %777 = vmatmul.msk.f32.gmra.mxu1 %vm100_vm1, %v250_v25 }
 0x449   :  { %v307_v26 = vpop.xlane.xlu0 %306 }
 0x44a   :  { %868 = vrcp.f32 %v307_v26 }
 0x450   :  { %v869_v27 = vpop.eup %868 }
 0x451   :  { %v311_v28 = vmul.f32 %v869_v27, %v853_v57 }
 0x453   :  { %775 = vmatmul.msk.f32.gmra.mxu0 %vm100_vm1, %v311_v28 }
 0x454   :  { %v630_v59 = vpop.permute.xlu1 %629 }
 0x45c   :  { %v626_v60 = vpop.permute.xlu0 %625 }
 0x488   :  { %v494_v34 = vpop.f32.mrf.mxu1 }
 0x49a   :  { %v529_v37 = vpop.f32.mrf.mxu2 }
 0x4a7   :  { %v566_v40 = vpop.f32.mrf.mxu3 }
 0x4a8   :  { %v532_v48 = vpop.f32.mrf.mxu2 }
 0x4ae   :  { %v465_v35 = vpop.f32.mrf.mxu0 }
 0x4af   :  { %v495_v36 = vadd.f32 %v494_v34, %v465_v35 }
 0x4b0   :  { %v569_v50 = vpop.f32.mrf.mxu3 }
 0x4b1   :  { %v535_v38 = vadd.f32 %v529_v37, %v495_v36 }
 0x4b3   :  { %v572_v41 = vadd.f32 %v566_v40, %v535_v38 }
 0x4b5   :  { %782 = vmatmul.msk.f32.vlgmr.msrb.gmra.mxu0 %vm131_vm2, %v572_v41 }
 0x4c3   :  { %v497_v45 = vpop.f32.mrf.mxu1 }
 0x4d0   :  { %v468_v46 = vpop.f32.mrf.mxu0 }
 0x4d1   :  { %v498_v47 = vadd.f32 %v497_v45, %v468_v46 }
 0x4d3   :  { %v536_v49 = vadd.f32 %v532_v48, %v498_v47 }
 0x4d5   :  { %v573_v51 = vadd.f32 %v569_v50, %v536_v49 }
 0x4d7   :  { %783 = vmatmul.msk.f32.gmra.mxu0 %vm131_vm2, %v573_v51 }
 0x532   :  { %v615_v52 = vpop.f32.mrf.mxu0 }
 0x533   :  { %v616_v56 = vadd.f32 %v615_v52, %v590_v53 }
 0x535   :  { %v621_v58 = vmax.f32 %v616_v56, 0.0 }
 0x554   :  { %v618_v54 = vpop.f32.mrf.mxu0 }
 0x555   :  { %v619_v55 = vadd.f32 %v618_v54, %v590_v53 }
 0x557   :  { %v622_v57 = vmax.f32 %v619_v55, 0.0 }
 0x559   :  { %784 = vmatpush.xpose.msk.msrb.mxu1 %vm100_vm1, %v622_v57 }
 0x55d   :  { %785 = vmatpush.xpose.msk.msrb.mxu1 %vm100_vm1, %v621_v58 }
 0x560   :  { %786 = vmatmul.msk.f32.vlgmr.msrb.gmra.mxu1 %vm100_vm1, %v630_v59 }
 0x5dd   :  { %v656_v61 = vpop.f32.mrf.mxu1 }
 0x5de   :  { %v657_v62 = vadd.f32 %v656_v61, %v626_v60 }
 0x5e0   :  { %v660_v63 = vmin.f32 %v657_v62, 20.0  ;;  %vm659_vm5 = vcmp.gt.f32.partialorder %v657_v62, 20.0 }
 0x5e2   :  { %v661_v1 = vmul.f32 1.442695, %v660_v63 }
 0x5e4   :  { %870 = vpow2.f32 %v661_v1 }
 0x5ea   :  { %v871_v2 = vpop.eup %870 }
 0x5eb   :  { %v663_v3 = vadd.f32 1.0, %v871_v2  ;;  %v666_v0 = vmul.f32 -0.5, %v871_v2  ;;  %v669_v5 = vand.u32 2147483647, %v871_v2 }
 0x5ed   :  { %872 = vlog2.f32 %v663_v3  ;;  %v667_v12 = vadd.f32 1.0, %v666_v0  ;;  %vm670_vm3 = vcmp.lt.f32.partialorder %v669_v5, 0.0004427343 }
 0x5ef   :  { %v668_v8 = vmul.f32 %v871_v2, %v667_v12 }
 0x5f3   :  { %v873_v6 = vpop.eup %872 }
 0x5f4   :  { %v665_v7 = vmul.f32 0.6931472, %v873_v6 }
 0x5f6   :  { %v671_v9 = vsel %vm670_vm3, %v668_v8, %v665_v7 }
 0x5f7   :  { %v672_v10 = vsel %vm659_vm5, %v657_v62, %v671_v9 }
 0x5f8   :  { %v700_v11 = vsel %vm699_vm4, %v672_v10, -inf  ;;  %v674_v17 = vsel %vm673_vm6, %v672_v10, -inf }
 0x5f9   :  { %701 = vmax.xlane.f32.xlu2 %v700_v11 }
 0x66c   :  { %v702_v13 = vpop.xlane.xlu2 %701 }
 0x66d   :  { %v703_v14 = vsub.f32 %v672_v10, %v702_v13 }
 0x66f   :  { %v704_v15 = vmul.f32 1.442695, %v703_v14 }
 0x671   :  { %874 = vpow2.f32 %v704_v15 }
 0x677   :  { %v875_v16 = vpop.eup %874 }
 0x678   :  { %707 = vrot.lane.b32.xlu1 %v875_v16, %s944_s25 }
 0x6a2   :  { %675 = vmax.xlane.f32.xlu1 %v674_v17 }
 0x6ea   :  { %v708_v18 = vpop.permute.xlu1 %707 }
 0x6eb   :  { %v710_v19 = vsel %vm673_vm6, %v708_v18, 0.0 }
 0x6ec   :  { %711 = vadd.xlane.f32.xlu0 %v710_v19 }
 0x715   :  { %v676_v20 = vpop.xlane.xlu1 %675 }
 0x716   :  { %v677_v21 = vsub.f32 %v672_v10, %v676_v20 }
 0x718   :  { %v678_v22 = vmul.f32 1.442695, %v677_v21 }
 0x71a   :  { %876 = vpow2.f32 %v678_v22 }
 0x720   :  { %v877_v23 = vpop.eup %876 }
 0x721   :  { %v680_v24 = vsel %vm673_vm6, %v877_v23, 0.0 }
 0x722   :  { %681 = vadd.xlane.f32.xlu2 %v680_v24 }
 0x75f   :  { %v712_v25 = vpop.xlane.xlu0 %711 }
 0x760   :  { %878 = vrcp.f32 %v712_v25  ;;  %v724_v29 = vand.u32 2147483648, %v712_v25  ;;  %v722_v31 = vand.u32 2147483647, %v712_v25  ;;  %vm718_vm8 = vweird.f32 %v712_v25 }
 0x762   :  { %v725_v33 = vor.u32 1.1754944e-38, %v724_v29  ;;  %vm723_vm10 = vcmp.eq.f32.partialorder %v722_v31, 8.507059e+37 }
 0x766   :  { %v879_v26 = vpop.eup %878 }
 0x767   :  { %v714_v27 = vmul.f32 %v879_v26, %v712_v25  ;;  %vm719_vm7 = vweird.f32 %v879_v26 }
 0x768   :  { %vm720_vm9 = vmor %vm718_vm8, %vm719_vm7 }
 0x769   :  { %v715_v28 = vsub.f32 1.0, %v714_v27 }
 0x76b   :  { %v716_v30 = vmul.f32 %v879_v26, %v715_v28 }
 0x76d   :  { %v717_v32 = vadd.f32 %v879_v26, %v716_v30 }
 0x76f   :  { %v721_v4 = vsel %vm720_vm9, %v879_v26, %v717_v32 }
 0x770   :  { %v726_v34 = vsel %vm723_vm10, %v725_v33, %v721_v4 }
 0x771   :  { %v727_v35 = vmul.f32 %v875_v16, %v726_v34 }
 0x773   :  { %729 = vrot.lane.b32.xlu2 %v727_v35, %s944_s25 }
 0x795   :  { %v682_v36 = vpop.xlane.xlu2 %681 }
 0x796   :  { %880 = vrcp.f32 %v682_v36  ;;  %v694_v41 = vand.u32 2147483648, %v682_v36  ;;  %v692_v43 = vand.u32 2147483647, %v682_v36  ;;  %vm688_vm12 = vweird.f32 %v682_v36 }
 0x798   :  { %v695_v46 = vor.u32 1.1754944e-38, %v694_v41  ;;  %vm693_vm14 = vcmp.eq.f32.partialorder %v692_v43, 8.507059e+37 }
 0x79c   :  { %v881_v37 = vpop.eup %880 }
 0x79d   :  { %v684_v38 = vmul.f32 %v881_v37, %v682_v36  ;;  %vm689_vm11 = vweird.f32 %v881_v37 }
 0x79e   :  { %vm690_vm13 = vmor %vm688_vm12, %vm689_vm11 }
 0x79f   :  { %v685_v40 = vsub.f32 1.0, %v684_v38 }
 0x7a1   :  { %v686_v42 = vmul.f32 %v881_v37, %v685_v40 }
 0x7a3   :  { %v687_v45 = vadd.f32 %v881_v37, %v686_v42 }
 0x7a5   :  { %v691_v47 = vsel %vm690_vm13, %v881_v37, %v687_v45 }
 0x7a6   :  { %v696_v48 = vsel %vm693_vm14, %v695_v46, %v691_v47 }
 0x7a7   :  { %v697_v49 = vmul.f32 %v877_v23, %v696_v48 }
 0x7a9   :  { %698 = vst.msk [vmem:[#allocation5] sm:$0x1] %vm673_vm6, %v697_v49 }
 0x7cd   :  { %v730_v50 = vpop.permute.xlu2 %729 }
 0x7ce   :  { %732 = vst.msk [vmem:[#allocation5 + $0x1] sm:$0x1] %vm673_vm6, %v730_v50 }
 0x7cf   :  { %743 = dma.vmem_to_hbm [thread:$0]  %s739_s29, 32, %s741_s4, [#allocation4]  }
 0x7d0   :  { %932 = dma.done.wait [#allocation4], 32  }
 0x7d1   :  { %933 = vsyncadd [#allocation4], 4294967264 }
 0x7d2   :  { %748 = vsyncpa [#allocation3], 1 }
 0x7d3   :  { %749 = vsyncpa [#allocation4], 1 }

</bundles_post_ra>
